<compile_context>
chip_gen: v6e
topology: v6e:2x2x1
jax: 0.10.0
libtpu: 0.0.40
codegen_flags: <defaults>
</compile_context>

<pallas_src>
import functools
import math

import jax
import jax.numpy as jnp
from jax.experimental import pallas as pl
from jax.experimental.pallas import tpu as pltpu


NEG_INF = -1e30  # finite sentinel: avoids inf-inf -> NaN in the online-softmax recurrence


def _round_up(x, m):
    return (x + m - 1) // m * m


# ----------------------------- in-kernel helpers -----------------------------

def _layernorm(x, gamma, beta, eps=1e-5):
    """LayerNorm over the last dim (two-pass variance, matches torch nn.LayerNorm)."""
    x = x.astype(jnp.float32)
    mu = jnp.mean(x, axis=-1, keepdims=True)
    var = jnp.mean((x - mu) * (x - mu), axis=-1, keepdims=True)
    return (x - mu) * jax.lax.rsqrt(var + eps) * gamma + beta


# --------------------------- pass 1: K/V projection ---------------------------
# grid = (batch, seq-chunks). y = LN(x_chunk); K,V = y @ W_kv, written head-major.

def _kv_proj_kernel(x_ref, ag_ref, ab_ref, wkv_ref, k_ref, v_ref,
                    *, heads, dim_head, compute_dtype):
    inner = heads * dim_head
    y = _layernorm(x_ref[0], ag_ref[0], ab_ref[0]).astype(compute_dtype)
    kv = jnp.dot(y, wkv_ref[...].astype(compute_dtype),
                 preferred_element_type=jnp.float32).astype(compute_dtype)  # (TS, 2*inner)
    for h in range(heads):
        lo = h * dim_head
        k_ref[0, h, :, :] = kv[:, lo:lo + dim_head]
        v_ref[0, h, :, :] = kv[:, inner + lo:inner + lo + dim_head]


# ------------------- pass 2: fused flash attention + MLP ---------------------
# grid = (batch, q-tiles, kv-tiles); kv is the reduction axis ("arbitrary").
#   kv == 0      : compute q for the tile (scale folded in), init m/l/acc scratch
#   every kv step: online-softmax update with a (H, TQ, TK) score block
#   kv == last   : ctx = acc / l, out-proj, +residual, LN, MLP(GELU), +residual, store

def _attn_ff_kernel(x_ref, k_ref, v_ref,
                    ag_ref, ab_ref, wq_ref, wout_ref, bout_ref,
                    fg_ref, fb_ref, w1_ref, b1_ref, w2_ref, b2_ref,
                    o_ref,
                    q_scr, m_scr, l_scr, acc_scr, ctx_scr,
                    *, heads, dim_head, scale, tile_k, seq_len, needs_mask,
                    compute_dtype, approx_recip):
    cd = compute_dtype
    kv = pl.program_id(2)

    @pl.when(kv == 0)
    def _init():
        yq = _layernorm(x_ref[0], ag_ref[0], ab_ref[0]).astype(cd)
        # fold 1/sqrt(dh) into q (TQ*inner elements) instead of the (H,TQ,N) scores
        q = (jnp.dot(yq, wq_ref[...].astype(cd),
                     preferred_element_type=jnp.float32) * scale).astype(cd)
        for h in range(heads):
            q_scr[h, :, :] = q[:, h * dim_head:(h + 1) * dim_head]
        m_scr[...] = jnp.full(m_scr.shape, NEG_INF, m_scr.dtype)
        l_scr[...] = jnp.zeros(l_scr.shape, l_scr.dtype)
        acc_scr[...] = jnp.zeros(acc_scr.shape, acc_scr.dtype)

    kh = k_ref[0]                                                       # (H, TK, dh)
    vh = v_ref[0]                                                       # (H, TK, dh)
    s = jnp.einsum('hqd,hkd->hqk', q_scr[...], kh,
                   preferred_element_type=jnp.float32)                  # (H, TQ, TK)
    if needs_mask:  # mask padded key columns (only emitted when N was padded)
        col = jax.lax.broadcasted_iota(jnp.int32, s.shape, 2) + kv * tile_k
        s = jnp.where(col < seq_len, s, NEG_INF)

    m_prev = m_scr[...]
    m_new = jnp.maximum(m_prev, jnp.max(s, axis=-1, keepdims=True))
    alpha = jnp.exp(m_prev - m_new)
    p = jnp.exp(s - m_new)
    l_scr[...] = alpha * l_scr[...] + jnp.sum(p, axis=-1, keepdims=True)
    acc_scr[...] = alpha * acc_scr[...] + jnp.einsum(
        'hqk,hkd->hqd', p.astype(cd), vh, preferred_element_type=jnp.float32)
    m_scr[...] = m_new

    @pl.when(kv == pl.num_programs(2) - 1)
    def _finalize():
        # normalize AFTER the PV matmul: (H,TQ,dh) multiplies instead of (H,TQ,N)
        inv_l = pl.reciprocal(l_scr[...], approx=approx_recip)          # (H, TQ, 1) on EUP
        ctx = acc_scr[...] * inv_l                                      # (H, TQ, dh)
        # merge heads ('b h n d -> b n (h d)') into a lane-dense (TQ, inner) slab
        for h in range(heads):
            ctx_scr[:, h * dim_head:(h + 1) * dim_head] = ctx[h].astype(cd)
        attn_out = jnp.dot(ctx_scr[...], wout_ref[...].astype(cd),
                           preferred_element_type=jnp.float32) + bout_ref[0]
        x1 = attn_out + x_ref[0].astype(jnp.float32)                    # residual 1 (f32)

        # feed-forward: PreNorm -> Linear -> GELU(exact erf, matches torch) -> Linear
        y2 = _layernorm(x1, fg_ref[0], fb_ref[0]).astype(cd)
        h1 = jnp.dot(y2, w1_ref[...].astype(cd),
                     preferred_element_type=jnp.float32) + b1_ref[0]
        h1 = jax.nn.gelu(h1, approximate=False)
        ff = jnp.dot(h1.astype(cd), w2_ref[...].astype(cd),
                     preferred_element_type=jnp.float32) + b2_ref[0]
        o_ref[0] = (ff + x1).astype(o_ref.dtype)                        # residual 2


# ------------------------------- pallas wrapper -------------------------------

@functools.lru_cache(maxsize=1)
def _resident_weight_kwargs():
    """BlockSpec kwargs making constant-index weight blocks single-buffered (resident),
    halving their VMEM footprint. Probed once; silently fall back to default
    double-buffering if this JAX build does not support pipeline_mode."""
    if not hasattr(pl, "Buffered"):
        return {}
    try:
        spec = pl.BlockSpec((8, 128), lambda i: (0, 0), pipeline_mode=pl.Buffered(1))

        def _probe(w_ref, o_ref):
            o_ref[...] = w_ref[...] + 1.0

        out = pl.pallas_call(
            _probe,
            out_shape=jax.ShapeDtypeStruct((8, 128), jnp.float32),
            grid=(2,),
            in_specs=[spec],
            out_specs=pl.BlockSpec((8, 128), lambda i: (0, 0)),
        )(jnp.zeros((8, 128), jnp.float32))
        jax.block_until_ready(out)
        return {"pipeline_mode": pl.Buffered(1)}
    except Exception:
        return {}


def transformer_layer(x, attn_p, ff_p, *, heads, dim_head, mlp_dim,
                      tile_q=128, tile_k=128, compute_dtype=jnp.bfloat16):
    B, N, D = x.shape
    inner = heads * dim_head
    cd = compute_dtype

    # tile sizes: multiples of 8, pad N up (with key masking) instead of tiny tiles
    tq = min(tile_q, _round_up(N, 8))
    tk = min(tile_k, _round_up(N, 8))
    n_pad = _round_up(N, math.lcm(tq, tk))
    needs_mask = n_pad != N
    xp = jnp.pad(x, ((0, 0), (0, n_pad - N), (0, 0))) if needs_mask else x

    wkw = _resident_weight_kwargs()

    def _resident(shape):
        nd = len(shape)
        return pl.BlockSpec(shape, lambda *_, nd=nd: (0,) * nd, **wkw)

    # MXU operands (weights) stored in the compute dtype; biases / LN params stay f32
    wq = attn_p["wqkv"][:, :inner].astype(cd)
    wkv = attn_p["wqkv"][:, inner:].astype(cd)
    wout = attn_p["wout"].astype(cd)
    w1 = ff_p["w1"].astype(cd)
    w2 = ff_p["w2"].astype(cd)

    # ---------------- pass 1: chunked LN + K/V projection -> head-major HBM ----------------
    k_hbm, v_hbm = pl.pallas_call(
        functools.partial(_kv_proj_kernel, heads=heads, dim_head=dim_head,
                          compute_dtype=cd),
        out_shape=(jax.ShapeDtypeStruct((B, heads, n_pad, dim_head), cd),
                   jax.ShapeDtypeStruct((B, heads, n_pad, dim_head), cd)),
        grid=(B, n_pad // tk),
        in_specs=[pl.BlockSpec((1, tk, D), lambda b, s: (b, s, 0)),
                  _resident((1, D)), _resident((1, D)),
                  _resident((D, 2 * inner))],
        out_specs=(pl.BlockSpec((1, heads, tk, dim_head), lambda b, s: (b, 0, s, 0)),
                   pl.BlockSpec((1, heads, tk, dim_head), lambda b, s: (b, 0, s, 0))),
        compiler_params=pltpu.CompilerParams(
            dimension_semantics=("parallel", "parallel"),
            vmem_limit_bytes=48 * 1024 * 1024),
    )(xp, attn_p["ln_g"], attn_p["ln_b"], wkv)

    # ------- pass 2: fused flash attention + out-proj + residual + LN + MLP + residual -------
    kern = functools.partial(
        _attn_ff_kernel, heads=heads, dim_head=dim_head, scale=dim_head ** -0.5,
        tile_k=tk, seq_len=N, needs_mask=needs_mask, compute_dtype=cd,
        approx_recip=(cd != jnp.float32))

    out = pl.pallas_call(
        kern,
        out_shape=jax.ShapeDtypeStruct((B, n_pad, D), x.dtype),
        grid=(B, n_pad // tq, n_pad // tk),
        in_specs=[
            pl.BlockSpec((1, tq, D), lambda b, q, k: (b, q, 0)),          # x (query tile)
            pl.BlockSpec((1, heads, tk, dim_head), lambda b, q, k: (b, 0, k, 0)),  # K chunk
            pl.BlockSpec((1, heads, tk, dim_head), lambda b, q, k: (b, 0, k, 0)),  # V chunk
            _resident((1, D)), _resident((1, D)),                         # attn LN gamma/beta
            _resident((D, inner)),                                        # W_q
            _resident((inner, D)), _resident((1, D)),                     # W_out, b_out
            _resident((1, D)), _resident((1, D)),                         # ff LN gamma/beta
            _resident((D, mlp_dim)), _resident((1, mlp_dim)),             # W1, b1
            _resident((mlp_dim, D)), _resident((1, D)),                   # W2, b2
        ],
        out_specs=pl.BlockSpec((1, tq, D), lambda b, q, k: (b, q, 0)),
        scratch_shapes=[
            pltpu.VMEM((heads, tq, dim_head), cd),           # q (head-major), per q-tile
            pltpu.VMEM((heads, tq, 1), jnp.float32),         # running max
            pltpu.VMEM((heads, tq, 1), jnp.float32),         # running denominator
            pltpu.VMEM((heads, tq, dim_head), jnp.float32),  # un-normalized context acc
            pltpu.VMEM((tq, inner), cd),                     # merged-head context
        ],
        compiler_params=pltpu.CompilerParams(
            # batch AND q-tile axes parallel (v7x megacore); the kv axis carries the
            # online-softmax scratch, so it must stay sequential ("arbitrary").
            dimension_semantics=("parallel", "parallel", "arbitrary"),
            # working set is bounded per (TQ, TK) tile; 48 MiB fits v7x's 64 MiB VMEM
            vmem_limit_bytes=48 * 1024 * 1024),
    )(xp, k_hbm, v_hbm,
      attn_p["ln_g"], attn_p["ln_b"], wq, wout, attn_p["bout"],
      ff_p["ln_g"], ff_p["ln_b"], w1, ff_p["b1"], w2, ff_p["b2"])

    return out[:, :N, :] if needs_mask else out


def transformer_forward(x, layers, *, heads, dim_head, mlp_dim,
                        tile_q=128, tile_k=128, compute_dtype=jnp.bfloat16):
    for attn_p, ff_p in layers:
        x = transformer_layer(x, attn_p, ff_p, heads=heads, dim_head=dim_head,
                              mlp_dim=mlp_dim, tile_q=tile_q, tile_k=tile_k,
                              compute_dtype=compute_dtype)
    return x


# ------------------------------ param init (synthetic) ------------------------------

def init_params(key, *, dim, depth, heads, dim_head, mlp_dim):
    inner = heads * dim_head
    layers = []
    for _ in range(depth):
        key, *ks = jax.random.split(key, 7)
        attn_p = {
            "ln_g": jnp.ones((1, dim), jnp.float32),
            "ln_b": jnp.zeros((1, dim), jnp.float32),
            "wqkv": jax.random.normal(ks[0], (dim, 3 * inner), jnp.float32) * 0.05,
            "wout": jax.random.normal(ks[1], (inner, dim), jnp.float32) * 0.05,
            "bout": jax.random.normal(ks[2], (1, dim), jnp.float32) * 0.01,
        }
        ff_p = {
            "ln_g": jnp.ones((1, dim), jnp.float32),
            "ln_b": jnp.zeros((1, dim), jnp.float32),
            "w1": jax.random.normal(ks[3], (dim, mlp_dim), jnp.float32) * 0.05,
            "b1": jax.random.normal(ks[4], (1, mlp_dim), jnp.float32) * 0.01,
            "w2": jax.random.normal(ks[5], (mlp_dim, dim), jnp.float32) * 0.05,
            "b2": jnp.zeros((1, dim), jnp.float32),
        }
        layers.append((attn_p, ff_p))
    return layers


# ------------------------------ pure-JAX reference ------------------------------

def _ref_forward(x, layers, *, heads, dim_head, mlp_dim):
    def ln(x, g, b):
        mu = jnp.mean(x, -1, keepdims=True)
        var = jnp.mean((x - mu) ** 2, -1, keepdims=True)
        return (x - mu) * jax.lax.rsqrt(var + 1e-5) * g + b

    inner = heads * dim_head
    for ap, fp in layers:
        y = ln(x, ap["ln_g"][0], ap["ln_b"][0])
        qkv = y @ ap["wqkv"]
        q, k, v = jnp.split(qkv, 3, axis=-1)

        def to_heads(t):
            B, N, _ = t.shape
            return t.reshape(B, N, heads, dim_head).transpose(0, 2, 1, 3)
        q, k, v = map(to_heads, (q, k, v))
        dots = jnp.einsum("bhqd,bhkd->bhqk", q, k) * (dim_head ** -0.5)
        attn = jax.nn.softmax(dots, axis=-1)
        o = jnp.einsum("bhqk,bhkd->bhqd", attn, v)
        o = o.transpose(0, 2, 1, 3).reshape(x.shape[0], x.shape[1], inner)
        x = o @ ap["wout"] + ap["bout"][0] + x
        y = ln(x, fp["ln_g"][0], fp["ln_b"][0])
        h = jax.nn.gelu(y @ fp["w1"] + fp["b1"][0], approximate=False)
        x = h @ fp["w2"] + fp["b2"][0] + x
    return x


# ------------------------------------ main ------------------------------------

if __name__ == "__main__":
    B, N, D = 2, 8, 32
    heads, dim_head, mlp_dim, depth = 4, 16, 64, 2

    key = jax.random.PRNGKey(0)
    kx, kx2, kp = jax.random.split(key, 3)
    x = jax.random.normal(kx, (B, N, D), jnp.float32)
    layers = init_params(kp, dim=D, depth=depth, heads=heads,
                         dim_head=dim_head, mlp_dim=mlp_dim)

    ref = _ref_forward(x, layers, heads=heads, dim_head=dim_head, mlp_dim=mlp_dim)

    # 1) f32 compute path: tight-tolerance check of the fused flash kernel logic.
    out_f32 = transformer_forward(x, layers, heads=heads, dim_head=dim_head,
                                  mlp_dim=mlp_dim, compute_dtype=jnp.float32)
    out_f32 = jax.block_until_ready(out_f32)
    assert out_f32.shape == (B, N, D)
    assert jnp.allclose(out_f32, ref, atol=1e-4, rtol=1e-4), "f32 kernel mismatch vs reference"

    # 2) bf16 MXU-operand path (production config; f32 accumulation, f32 residual stream).
    out_bf16 = transformer_forward(x, layers, heads=heads, dim_head=dim_head,
                                   mlp_dim=mlp_dim, compute_dtype=jnp.bfloat16)
    out_bf16 = jax.block_until_ready(out_bf16)
    max_err = float(jnp.max(jnp.abs(out_bf16 - ref)))
    assert max_err < 5e-2, f"bf16 kernel deviates too much from reference: {max_err}"

    # 3) non-tile-aligned sequence: exercises the pad + key-mask path.
    N2 = 12
    x2 = jax.random.normal(kx2, (B, N2, D), jnp.float32)
    ref2 = _ref_forward(x2, layers, heads=heads, dim_head=dim_head, mlp_dim=mlp_dim)
    out2 = transformer_forward(x2, layers, heads=heads, dim_head=dim_head,
                               mlp_dim=mlp_dim, compute_dtype=jnp.float32)
    out2 = jax.block_until_ready(out2)
    assert out2.shape == (B, N2, D)
    assert jnp.allclose(out2, ref2, atol=1e-4, rtol=1e-4), "masked/padded path mismatch"

    print("KERNEL_OK")
</pallas_src>

<mosaic_0001>
module attributes {stable_mosaic.version = 11 : i64} {
  func.func @_probe(%arg0: i32, %arg1: memref<8x128xf32, #tpu.memory_space<vmem>>, %arg2: memref<8x128xf32, #tpu.memory_space<vmem>>) attributes {dimension_semantics = [#tpu.dimension_semantics<arbitrary>], iteration_bounds = array<i64: 2>, scalar_prefetch = 0 : i64, scratch_operands = 0 : i64, tpu.core_type = #tpu.core_type<tc>, window_params = [{pipeline_mode = #tpu.pipeline_mode<synchronous>, transform_indices = @transform_0, window_bounds = array<i64: 8, 128>}, {pipeline_mode = #tpu.pipeline_mode<synchronous>, transform_indices = @transform_1, window_bounds = array<i64: 8, 128>}]} {
    %c0 = arith.constant 0 : index
    %c0_0 = arith.constant 0 : index
    %0 = vector.load %arg1[%c0, %c0_0] : memref<8x128xf32, #tpu.memory_space<vmem>>, vector<8x128xf32>
    %cst = arith.constant 1.000000e+00 : f32
    %1 = vector.broadcast %cst : f32 to vector<8x128xf32>
    %2 = arith.addf %0, %1 : vector<8x128xf32>
    %c0_1 = arith.constant 0 : index
    %c0_2 = arith.constant 0 : index
    %3 = vector.load %arg2[%c0_1, %c0_2] : memref<8x128xf32, #tpu.memory_space<vmem>>, vector<8x128xf32>
    tpu.vector_store %arg2[%c0_1, %c0_2], %2 {strides = array<i32>} : memref<8x128xf32, #tpu.memory_space<vmem>>, vector<8x128xf32>,
    return
  }
  func.func @transform_0(%arg0: i32) -> (i32, i32) {
    %c0_i32 = arith.constant 0 : i32
    %c0_i32_0 = arith.constant 0 : i32
    %c0_i32_1 = arith.constant 0 : i32
    return %c0_i32, %c0_i32_0 : i32, i32
  }
  func.func @transform_1(%arg0: i32) -> (i32, i32) {
    %c0_i32 = arith.constant 0 : i32
    %c0_i32_0 = arith.constant 0 : i32
    %c0_i32_1 = arith.constant 0 : i32
    return %c0_i32, %c0_i32_0 : i32, i32
  }
}

module attributes {stable_mosaic.version = 11 : i64} {
  func.func @_kv_proj_kernel(%arg0: i32, %arg1: i32, %arg2: memref<1x8x32xf32, #tpu.memory_space<vmem>>, %arg3: memref<1x32xf32, #tpu.memory_space<vmem>>, %arg4: memref<1x32xf32, #tpu.memory_space<vmem>>, %arg5: memref<32x128xf32, #tpu.memory_space<vmem>>, %arg6: memref<1x4x8x16xf32, #tpu.memory_space<vmem>>, %arg7: memref<1x4x8x16xf32, #tpu.memory_space<vmem>>) attributes {dimension_semantics = [#tpu.dimension_semantics<parallel>, #tpu.dimension_semantics<parallel>], iteration_bounds = array<i64: 2, 1>, scalar_prefetch = 0 : i64, scratch_operands = 0 : i64, tpu.core_type = #tpu.core_type<tc>, window_params = [{transform_indices = @transform_0, window_bounds = array<i64: 1, 8, 32>}, {pipeline_mode = #tpu.pipeline_mode<synchronous>, transform_indices = @transform_1, window_bounds = array<i64: 1, 32>}, {pipeline_mode = #tpu.pipeline_mode<synchronous>, transform_indices = @transform_2, window_bounds = array<i64: 1, 32>}, {pipeline_mode = #tpu.pipeline_mode<synchronous>, transform_indices = @transform_3, window_bounds = array<i64: 32, 128>}, {transform_indices = @transform_4, window_bounds = array<i64: 1, 4, 8, 16>}, {transform_indices = @transform_5, window_bounds = array<i64: 1, 4, 8, 16>}]} {
    %c0 = arith.constant 0 : index
    %c0_0 = arith.constant 0 : index
    %c0_1 = arith.constant 0 : index
    %0 = vector.load %arg2[%c0, %c0_0, %c0_1] : memref<1x8x32xf32, #tpu.memory_space<vmem>>, vector<1x8x32xf32>
    %1 = vector.shape_cast %0 : vector<1x8x32xf32> to vector<8x32xf32>
    %c0_2 = arith.constant 0 : index
    %c0_3 = arith.constant 0 : index
    %2 = vector.load %arg3[%c0_2, %c0_3] : memref<1x32xf32, #tpu.memory_space<vmem>>, vector<1x32xf32>
    %3 = vector.shape_cast %2 : vector<1x32xf32> to vector<32xf32>
    %c0_4 = arith.constant 0 : index
    %c0_5 = arith.constant 0 : index
    %4 = vector.load %arg4[%c0_4, %c0_5] : memref<1x32xf32, #tpu.memory_space<vmem>>, vector<1x32xf32>
    %5 = vector.shape_cast %4 : vector<1x32xf32> to vector<32xf32>
    %cst = arith.constant dense<0.000000e+00> : vector<8xf32>
    %6 = vector.multi_reduction <add>, %1, %cst [1] : vector<8x32xf32> to vector<8xf32>
    %7 = vector.shape_cast %6 : vector<8xf32> to vector<8x1xf32>
    %cst_6 = arith.constant 3.200000e+01 : f32
    %8 = vector.broadcast %cst_6 : f32 to vector<8x1xf32>
    %9 = arith.divf %7, %8 : vector<8x1xf32>
    %10 = vector.broadcast %9 : vector<8x1xf32> to vector<8x32xf32>
    %11 = arith.subf %1, %10 : vector<8x32xf32>
    %12 = vector.broadcast %9 : vector<8x1xf32> to vector<8x32xf32>
    %13 = arith.subf %1, %12 : vector<8x32xf32>
    %14 = arith.mulf %11, %13 : vector<8x32xf32>
    %cst_7 = arith.constant dense<0.000000e+00> : vector<8xf32>
    %15 = vector.multi_reduction <add>, %14, %cst_7 [1] : vector<8x32xf32> to vector<8xf32>
    %16 = vector.shape_cast %15 : vector<8xf32> to vector<8x1xf32>
    %cst_8 = arith.constant 3.200000e+01 : f32
    %17 = vector.broadcast %cst_8 : f32 to vector<8x1xf32>
    %18 = arith.divf %16, %17 : vector<8x1xf32>
    %19 = vector.broadcast %9 : vector<8x1xf32> to vector<8x32xf32>
    %20 = arith.subf %1, %19 : vector<8x32xf32>
    %cst_9 = arith.constant 9.99999974E-6 : f32
    %21 = vector.broadcast %cst_9 : f32 to vector<8x1xf32>
    %22 = arith.addf %18, %21 : vector<8x1xf32>
    %23 = math.rsqrt %22 : vector<8x1xf32>
    %24 = vector.broadcast %23 : vector<8x1xf32> to vector<8x32xf32>
    %25 = arith.mulf %20, %24 : vector<8x32xf32>
    %26 = vector.shape_cast %3 : vector<32xf32> to vector<1x32xf32>
    %27 = vector.broadcast %26 : vector<1x32xf32> to vector<8x32xf32>
    %28 = arith.mulf %25, %27 : vector<8x32xf32>
    %29 = vector.shape_cast %5 : vector<32xf32> to vector<1x32xf32>
    %30 = vector.broadcast %29 : vector<1x32xf32> to vector<8x32xf32>
    %31 = arith.addf %28, %30 : vector<8x32xf32>
    %c0_10 = arith.constant 0 : index
    %c0_11 = arith.constant 0 : index
    %32 = vector.load %arg5[%c0_10, %c0_11] : memref<32x128xf32, #tpu.memory_space<vmem>>, vector<32x128xf32>
    %cst_12 = arith.constant dense<0.000000e+00> : vector<8x128xf32>
    %33 = tpu.matmul %31, %32, %cst_12 {dimension_numbers = #tpu.dot_dimension_numbers<[1], [0], [0], [1], [0, 0, 1, 1], [], []>} : vector<8x32xf32>, vector<32x128xf32>, vector<8x128xf32> -> vector<8x128xf32>
    %34 = vector.extract_strided_slice %33 {offsets = [0, 0], sizes = [8, 16], strides = [1, 1]} : vector<8x128xf32> to vector<8x16xf32>
    %c0_13 = arith.constant 0 : index
    %c0_14 = arith.constant 0 : index
    %c0_15 = arith.constant 0 : index
    %c0_16 = arith.constant 0 : index
    %35 = vector.load %arg6[%c0_13, %c0_14, %c0_15, %c0_16] : memref<1x4x8x16xf32, #tpu.memory_space<vmem>>, vector<1x1x8x16xf32>
    %36 = vector.shape_cast %35 : vector<1x1x8x16xf32> to vector<8x16xf32>
    %37 = vector.shape_cast %34 : vector<8x16xf32> to vector<1x1x8x16xf32>
    tpu.vector_store %arg6[%c0_13, %c0_14, %c0_15, %c0_16], %37 {strides = array<i32>} : memref<1x4x8x16xf32, #tpu.memory_space<vmem>>, vector<1x1x8x16xf32>,
    %38 = vector.extract_strided_slice %33 {offsets = [0, 64], sizes = [8, 16], strides = [1, 1]} : vector<8x128xf32> to vector<8x16xf32>
    %c0_17 = arith.constant 0 : index
    %c0_18 = arith.constant 0 : index
    %c0_19 = arith.constant 0 : index
    %c0_20 = arith.constant 0 : index
    %39 = vector.load %arg7[%c0_17, %c0_18, %c0_19, %c0_20] : memref<1x4x8x16xf32, #tpu.memory_space<vmem>>, vector<1x1x8x16xf32>
    %40 = vector.shape_cast %39 : vector<1x1x8x16xf32> to vector<8x16xf32>
    %41 = vector.shape_cast %38 : vector<8x16xf32> to vector<1x1x8x16xf32>
    tpu.vector_store %arg7[%c0_17, %c0_18, %c0_19, %c0_20], %41 {strides = array<i32>} : memref<1x4x8x16xf32, #tpu.memory_space<vmem>>, vector<1x1x8x16xf32>,
    %42 = vector.extract_strided_slice %33 {offsets = [0, 16], sizes = [8, 16], strides = [1, 1]} : vector<8x128xf32> to vector<8x16xf32>
    %c0_21 = arith.constant 0 : index
    %c1 = arith.constant 1 : index
    %c0_22 = arith.constant 0 : index
    %c0_23 = arith.constant 0 : index
    %43 = vector.load %arg6[%c0_21, %c1, %c0_22, %c0_23] : memref<1x4x8x16xf32, #tpu.memory_space<vmem>>, vector<1x1x8x16xf32>
    %44 = vector.shape_cast %43 : vector<1x1x8x16xf32> to vector<8x16xf32>
    %45 = vector.shape_cast %42 : vector<8x16xf32> to vector<1x1x8x16xf32>
    tpu.vector_store %arg6[%c0_21, %c1, %c0_22, %c0_23], %45 {strides = array<i32>} : memref<1x4x8x16xf32, #tpu.memory_space<vmem>>, vector<1x1x8x16xf32>,
    %46 = vector.extract_strided_slice %33 {offsets = [0, 80], sizes = [8, 16], strides = [1, 1]} : vector<8x128xf32> to vector<8x16xf32>
    %c0_24 = arith.constant 0 : index
    %c1_25 = arith.constant 1 : index
    %c0_26 = arith.constant 0 : index
    %c0_27 = arith.constant 0 : index
    %47 = vector.load %arg7[%c0_24, %c1_25, %c0_26, %c0_27] : memref<1x4x8x16xf32, #tpu.memory_space<vmem>>, vector<1x1x8x16xf32>
    %48 = vector.shape_cast %47 : vector<1x1x8x16xf32> to vector<8x16xf32>
    %49 = vector.shape_cast %46 : vector<8x16xf32> to vector<1x1x8x16xf32>
    tpu.vector_store %arg7[%c0_24, %c1_25, %c0_26, %c0_27], %49 {strides = array<i32>} : memref<1x4x8x16xf32, #tpu.memory_space<vmem>>, vector<1x1x8x16xf32>,
    %50 = vector.extract_strided_slice %33 {offsets = [0, 32], sizes = [8, 16], strides = [1, 1]} : vector<8x128xf32> to vector<8x16xf32>
    %c0_28 = arith.constant 0 : index
    %c2 = arith.constant 2 : index
    %c0_29 = arith.constant 0 : index
    %c0_30 = arith.constant 0 : index
    %51 = vector.load %arg6[%c0_28, %c2, %c0_29, %c0_30] : memref<1x4x8x16xf32, #tpu.memory_space<vmem>>, vector<1x1x8x16xf32>
    %52 = vector.shape_cast %51 : vector<1x1x8x16xf32> to vector<8x16xf32>
    %53 = vector.shape_cast %50 : vector<8x16xf32> to vector<1x1x8x16xf32>
    tpu.vector_store %arg6[%c0_28, %c2, %c0_29, %c0_30], %53 {strides = array<i32>} : memref<1x4x8x16xf32, #tpu.memory_space<vmem>>, vector<1x1x8x16xf32>,
    %54 = vector.extract_strided_slice %33 {offsets = [0, 96], sizes = [8, 16], strides = [1, 1]} : vector<8x128xf32> to vector<8x16xf32>
    %c0_31 = arith.constant 0 : index
    %c2_32 = arith.constant 2 : index
    %c0_33 = arith.constant 0 : index
    %c0_34 = arith.constant 0 : index
    %55 = vector.load %arg7[%c0_31, %c2_32, %c0_33, %c0_34] : memref<1x4x8x16xf32, #tpu.memory_space<vmem>>, vector<1x1x8x16xf32>
    %56 = vector.shape_cast %55 : vector<1x1x8x16xf32> to vector<8x16xf32>
    %57 = vector.shape_cast %54 : vector<8x16xf32> to vector<1x1x8x16xf32>
    tpu.vector_store %arg7[%c0_31, %c2_32, %c0_33, %c0_34], %57 {strides = array<i32>} : memref<1x4x8x16xf32, #tpu.memory_space<vmem>>, vector<1x1x8x16xf32>,
    %58 = vector.extract_strided_slice %33 {offsets = [0, 48], sizes = [8, 16], strides = [1, 1]} : vector<8x128xf32> to vector<8x16xf32>
    %c0_35 = arith.constant 0 : index
    %c3 = arith.constant 3 : index
    %c0_36 = arith.constant 0 : index
    %c0_37 = arith.constant 0 : index
    %59 = vector.load %arg6[%c0_35, %c3, %c0_36, %c0_37] : memref<1x4x8x16xf32, #tpu.memory_space<vmem>>, vector<1x1x8x16xf32>
    %60 = vector.shape_cast %59 : vector<1x1x8x16xf32> to vector<8x16xf32>
    %61 = vector.shape_cast %58 : vector<8x16xf32> to vector<1x1x8x16xf32>
    tpu.vector_store %arg6[%c0_35, %c3, %c0_36, %c0_37], %61 {strides = array<i32>} : memref<1x4x8x16xf32, #tpu.memory_space<vmem>>, vector<1x1x8x16xf32>,
    %62 = vector.extract_strided_slice %33 {offsets = [0, 112], sizes = [8, 16], strides = [1, 1]} : vector<8x128xf32> to vector<8x16xf32>
    %c0_38 = arith.constant 0 : index
    %c3_39 = arith.constant 3 : index
    %c0_40 = arith.constant 0 : index
    %c0_41 = arith.constant 0 : index
    %63 = vector.load %arg7[%c0_38, %c3_39, %c0_40, %c0_41] : memref<1x4x8x16xf32, #tpu.memory_space<vmem>>, vector<1x1x8x16xf32>
    %64 = vector.shape_cast %63 : vector<1x1x8x16xf32> to vector<8x16xf32>
    %65 = vector.shape_cast %62 : vector<8x16xf32> to vector<1x1x8x16xf32>
    tpu.vector_store %arg7[%c0_38, %c3_39, %c0_40, %c0_41], %65 {strides = array<i32>} : memref<1x4x8x16xf32, #tpu.memory_space<vmem>>, vector<1x1x8x16xf32>,
    return
  }
  func.func @transform_0(%arg0: i32, %arg1: i32) -> (i32, i32, i32) {
    %c0_i32 = arith.constant 0 : i32
    %c0_i32_0 = arith.constant 0 : i32
    return %arg0, %arg1, %c0_i32 : i32, i32, i32
  }
  func.func @transform_1(%arg0: i32, %arg1: i32) -> (i32, i32) {
    %c0_i32 = arith.constant 0 : i32
    %c0_i32_0 = arith.constant 0 : i32
    %c0_i32_1 = arith.constant 0 : i32
    return %c0_i32, %c0_i32_0 : i32, i32
  }
  func.func @transform_2(%arg0: i32, %arg1: i32) -> (i32, i32) {
    %c0_i32 = arith.constant 0 : i32
    %c0_i32_0 = arith.constant 0 : i32
    %c0_i32_1 = arith.constant 0 : i32
    return %c0_i32, %c0_i32_0 : i32, i32
  }
  func.func @transform_3(%arg0: i32, %arg1: i32) -> (i32, i32) {
    %c0_i32 = arith.constant 0 : i32
    %c0_i32_0 = arith.constant 0 : i32
    %c0_i32_1 = arith.constant 0 : i32
    return %c0_i32, %c0_i32_0 : i32, i32
  }
  func.func @transform_4(%arg0: i32, %arg1: i32) -> (i32, i32, i32, i32) {
    %c0_i32 = arith.constant 0 : i32
    %c0_i32_0 = arith.constant 0 : i32
    %c0_i32_1 = arith.constant 0 : i32
    return %arg0, %c0_i32, %arg1, %c0_i32_0 : i32, i32, i32, i32
  }
  func.func @transform_5(%arg0: i32, %arg1: i32) -> (i32, i32, i32, i32) {
    %c0_i32 = arith.constant 0 : i32
    %c0_i32_0 = arith.constant 0 : i32
    %c0_i32_1 = arith.constant 0 : i32
    return %arg0, %c0_i32, %arg1, %c0_i32_0 : i32, i32, i32, i32
  }
}

</mosaic_0001>

<bundles_post_ra>
// kernel: tpu_custom_call.1
= control target key start
LH: loop header
LB: loop body
LE: loop exit
PB: predicated region body
PF: predicated region fallthrough
CT: control target
= control target key end

     0   :  { %6 = vsyncpa [#allocation3], 0  ;;  %s305_s0 = inlined_call_operand.hbm [shape: f32[8,128], index: 0, kind: input, shape index: {}]   ;;  %s306_s1 = inlined_call_operand.hbm [shape: f32[8,128], index: 1, kind: output, shape index: {}]  }
   0x1   :  { %7 = vsyncpa [#allocation4], 0  ;;  %s258_s6 = smov 0  }
   0x2 LB: > { %s145_s7 = sadd.s32 4294967295, %s244_s6   ;;  %p146_p0 = scmp.ge.s32.totalorder %s244_s6, 1  ;;  %s244_s6 = sphi %s258_s6, %s13_s6  }
   0x3   : > { %p60_p1 = scmp.lt.s32.totalorder %s244_s6, 3  ;;  %p270_p3 = scmp.eq.s32.totalorder %s145_s7, 0 }
   0x4   : > { %s246_s10 = smov [#allocation2]  }
   0x5   : > { %p266_p2 = pnand %p146_p0, %p60_p1  ;;  %s73_s11 = sshll.u32 %s246_s10, 4  ;;  %s74_s11 = int_to_ptr.vmem [resolvable:$true] %s73_s11 }
   0x6   : > { %s191_s12 = scalar_lea.vmem %s74_s11, 128  ;;  %p199_p10 = scmp.lt.s32.totalorder %s74_s11, %s74_s11 }
   0x7   : > { %p162_p4 = pneg %p266_p2  ;;  %p192_p7 = scmp.ne.s32.totalorder %s74_s11, %s191_s12 }
   0x8   : > { %p200_p11 = scmp.lt.s32.totalorder %s191_s12, %s191_s12 }
   0x9   : > { %p163_p5 = pnand %p270_p3, %p162_p4 }
   0xa   : > { %p201_p12 = por %p200_p11, %p199_p10 }
   0xb   : > { %p182_p6 = pneg %p163_p5 }
   0xd   : > { %p194_p8 = pnand %p192_p7, %p182_p6 }
   0xf   : > { %p195_p9 = pneg %p194_p8 }
  0x11   : > { %p202_p13 = pnand %p201_p12, %p195_p9 }
  0x13   : > { %205 = shalt.err (!%p202_p13)
}
  0x14   : > { %165 = dma.hbm_to_vmem [thread:$0]  (!%p163_p5), %s305_s0, 128, %s74_s11, [#allocation3]  }
  0x15   : > { %86 = sbr.rel (%p266_p2) target bundleno = 42 (0x2a), region = 24 }
  0x1a   : > { %235 = dma.done.wait (%p270_p3), [#allocation3], 128  }
  0x1b   : > { %237 = vsyncadd (%p270_p3), [#allocation3], 4294967168  ;;  %s247_s15 = smov [#allocation5]   ;;  %v96_v0 = vld [vmem:[#allocation2] sm:$0xff]  ;;  %p287_p0 = scmp.eq.s32.totalorder %s145_s7, 1 }
  0x1c   : > { %s106_s16 = sshll.u32 %s247_s15, 4  ;;  %v97_v1 = vadd.f32 1.0, %v96_v0  ;;  %s107_s16 = int_to_ptr.vmem [resolvable:$true] %s106_s16 }
  0x1d   : > { %s206_s18 = scalar_lea.vmem %s107_s16, 128  ;;  %p213_p5 = scmp.lt.s32.totalorder %s107_s16, %s107_s16 }
  0x1e   : > { %98 = vst [vmem:[#allocation5] sm:$0xff] %v97_v1  ;;  %p207_p1 = scmp.ne.s32.totalorder %s107_s16, %s206_s18  ;;  %p214_p6 = scmp.lt.s32.totalorder %s206_s18, %s206_s18 }
  0x20   : > { %p208_p2 = pnand %p207_p1, %p287_p0  ;;  %p215_p7 = por %p214_p6, %p213_p5 }
  0x22   : > { %p209_p4 = pneg %p208_p2 }
  0x24   : > { %p216_p3 = pnand %p215_p7, %p209_p4 }
  0x26   : > { %219 = shalt.err (!%p216_p3)
}
  0x27   : > { %159 = dma.vmem_to_hbm [thread:$0]  (%p287_p0), %s107_s16, 128, %s306_s1, [#allocation4]  }
  0x28   : > { %239 = dma.done.wait (%p287_p0), [#allocation4], 128  }
  0x29   : > { %241 = vsyncadd (%p287_p0), [#allocation4], 4294967168 }
  0x2a PF: > { %s13_s6 = sadd.s32 1, %s244_s6  }
  0x2b   : > { %p10_p8 = scmp.ge.s32.totalorder %s13_s6, 4  }
  0x2d   :  { %12 = sbr.rel (!%p10_p8) target bundleno = 2 (0x2), region = 53 }
  0x32   :  { %119 = vsyncpa [#allocation3], 1 }
  0x33   :  { %121 = vsyncpa [#allocation3 + $0x1], 1 }
  0x34   :  { %122 = vsyncpa [#allocation4], 1 }
  0x35   :  { %124 = vsyncpa [#allocation4 + $0x1], 1 }

// kernel: tpu_custom_call.1
= control target key start
LH: loop header
LB: loop body
LE: loop exit
PB: predicated region body
PF: predicated region fallthrough
CT: control target
= control target key end

     0   :  { %s1204_s0 = inlined_call_operand.hbm [shape: f32[2,8,32], index: 0, kind: input, shape index: {}]   ;;  %s1205_s1 = inlined_call_operand.vmem [shape: f32[1,32], index: 1, kind: input, shape index: {}]   ;;  %s1206_s2 = inlined_call_operand.vmem [shape: f32[1,32], index: 2, kind: input, shape index: {}]   ;;  %s1207_s3 = inlined_call_operand.hbm [shape: f32[32,128], index: 3, kind: input, shape index: {}]   ;;  %s1208_s4 = inlined_call_operand.hbm [shape: f32[2,4,8,16], index: 4, kind: output, shape index: {0}]   ;;  %s1209_s5 = inlined_call_operand.hbm [shape: f32[2,4,8,16], index: 5, kind: output, shape index: {1}]  }
   0x1   :  { %1212 = sst [smem:[#allocation15_spill]] %s1207_s3 }
   0x2   :  { %11 = vsyncpa [#allocation3], 0 }
   0x3   :  { %13 = vsyncpa [#allocation3 + $0x1], 0 }
   0x4   :  { %14 = vsyncpa [#allocation6], 0 }
   0x5   :  { %15 = vsyncpa [#allocation4], 0 }
   0x6   :  { %17 = vsyncpa [#allocation4 + $0x1], 0 }
   0x7   :  { %18 = vsyncpa [#allocation9], 0 }
   0x8   :  { %20 = vsyncpa [#allocation9 + $0x1], 0  ;;  %s953_s18 = smov 0   ;;  %s955_s19 = smov 0  }
   0x9   :  { %s957_s20 = smov 0   ;;  %s959_s21 = smov 0  }
   0xa   :  { %s961_s22 = smov 0   ;;  %s963_s23 = smov 0  }
   0xb LB: > { %s596_s24 = sadd.s32 4294967295, %s904_s23   ;;  %s597_s25 = sadd.s32 4294967294, %s904_s23   ;;  %s904_s23 = sphi %s963_s23, %s26_s23   ;;  %s900_s22 = sphi %s961_s22, %s1232_s22   ;;  %s896_s21 = sphi %s959_s21, %s1231_s21   ;;  %s892_s20 = sphi %s957_s20, %s1230_s20   ;;  %s888_s19 = sphi %s955_s19, %s1229_s19   ;;  %s884_s18 = sphi %s953_s18, %s1228_s18  }
   0xc   : > { %p60_p0 = scmp.ne.s32.totalorder %s888_s19, %s884_s18  ;;  %p987_p1 = scmp.eq.s32.totalorder %s596_s24, 0 }
   0xd   : > { %p991_p2 = scmp.eq.s32.totalorder %s596_s24, 1  ;;  %p155_p3 = scmp.eq.s32.totalorder %s597_s25, 1 }
   0xe   : > { %p997_p4 = por %p987_p1, %p60_p0  ;;  %p598_p5 = scmp.ge.s32.totalorder %s904_s23, 1 }
   0xf   : > { %p1002_p6 = por %p155_p3, %p60_p0  ;;  %p190_p7 = scmp.lt.s32.totalorder %s904_s23, 3 }
  0x10   : > { %s1215_s28 = scalar_select %p997_p4, 1, 0 }
  0x11   : > { %s1216_s29 = scalar_select %p1002_p6, 1, 0 }
  0x12   : > { %p1007_p8 = pnand %p598_p5, %p190_p7  ;;  %s906_s6 = smov [#allocation5]  }
  0x13   : > { %s208_s7 = sshll.u32 %s906_s6, 4  ;;  %s38_s9 = sadd.s32 1, %s900_s22  ;;  %s209_s7 = int_to_ptr.vmem [resolvable:$true] %s208_s7 }
  0x14   : > { %p653_p9 = pneg %p1007_p8  ;;  %s747_s10 = scalar_lea.vmem %s209_s7, 512 }
  0x15   : > { %p748_p13 = scmp.ne.s32.totalorder %s209_s7, %s747_s10  ;;  %p755_p5 = scmp.lt.s32.totalorder %s209_s7, %s209_s7 }
  0x16   : > { %p1016_p11 = pnand %p653_p9, %p987_p1  ;;  %p756_p7 = scmp.lt.s32.totalorder %s747_s10, %s747_s10 }
  0x18   : > { %p738_p12 = pneg %p1016_p11  ;;  %p757_p6 = por %p756_p7, %p755_p5 }
  0x1a   : > { %p750_p0 = pnand %p748_p13, %p738_p12 }
  0x1c   : > { %p751_p3 = pneg %p750_p0 }
  0x1e   : > { %p758_p4 = pnand %p757_p6, %p751_p3 }
  0x20   : > { %761 = shalt.err (!%p758_p4)
}
  0x21   : > { %s907_s11 = smov 128   ;;  %s908_s12 = smov 8  }
  0x22   : > { %s1219_s3 = sld [smem:[#allocation15_spill]]  ;;  %p40_p6 = scmp.ge.s32.totalorder %s38_s9, 2 }
  0x23   : > { %s47_s15 = sadd.s32 1, %s892_s20  ;;  %p54_p4 = scmp.ne.s32.totalorder %s892_s20, %s888_s19 }
  0x24   : > { %p55_p9 = scmp.eq.s32.totalorder %s904_s23, 0  ;;  %s1234_s9 = smov (%p40_p6, %s38_s9), 0 }
  0x25   : > { %1220 = sst [smem:[#allocation14_spill]] %s1234_s9  ;;  %p1040_p13 = por %p991_p2, %p54_p4 }
  0x26   : > { %p1034_p12 = por %p55_p9, %p54_p4  ;;  %s42_s24 = ssub.s32 %s900_s22, %s1234_s9 }
  0x27   : > { %p669_p0 = scmp.lt.s32.totalorder %s904_s23, 2  ;;  %s222_s25 = sand.u32 1, %s892_s20  }
  0x28   : > { %656 = dma.hbm_to_vmem [thread:$0]  (!%p1016_p11), %s1219_s3, 512, %s209_s7, [#allocation6], %s907_s11, %s907_s11, %s908_s12  }
  0x29   : > { %p45_p11 = scmp.eq.s32.totalorder %s42_s24, 0  ;;  %s601_s6 = sshll.u32 %s222_s25, 3 }
  0x2a   : > { %s602_s8 = sshll.u32 %s900_s22, 7  ;;  %s226_s13 = scalar_lea.vmem [#allocation2], %s601_s6 }
  0x2b   : > { %s1049_s7 = scalar_select %p45_p11, %s892_s20, %s47_s15  }
  0x2c   : > { %s232_s12 = scalar_lea.hbm %s1204_s0, %s602_s8  ;;  %s234_s14 = sshll.u32 %s226_s13, 4  ;;  %s235_s14 = int_to_ptr.vmem [resolvable:$true] %s234_s14 }
  0x2d   : > { %p1057_p2 = pnand %p669_p0, %p1034_p12  ;;  %s223_s3 = scalar_lea.sflag [#allocation3], %s222_s25 }
  0x2e   : > { %s775_s24 = scalar_lea.vmem %s235_s14, 128  ;;  %s909_s15 = smov [#allocation2]  }
  0x2f   : > { %p764_p3 = pneg %p1057_p2  ;;  %p776_p5 = scmp.ne.s32.totalorder %s235_s14, %s775_s24 }
  0x30   : > { %s780_s9 = sshll.u32 %s909_s15, 4  ;;  %s781_s9 = int_to_ptr.vmem [resolvable:$false] %s780_s9 }
  0x31   : > { %p778_p7 = pnand %p776_p5, %p764_p3  ;;  %s782_s8 = scalar_lea.vmem %s781_s9, 256 }
  0x32   : > { %p783_p4 = scmp.lt.s32.totalorder %s235_s14, %s781_s9  ;;  %p784_p9 = scmp.lt.s32.totalorder %s782_s8, %s775_s24 }
  0x33   : > { %p779_p6 = pneg %p778_p7 }
  0x34   : > { %p785_p11 = por %p784_p9, %p783_p4 }
  0x36   : > { %p786_p10 = pnand %p785_p11, %p779_p6 }
  0x38   : > { %789 = shalt.err (!%p786_p10)
}
  0x39   : > { %660 = dma.hbm_to_vmem [thread:$0]  (!%p1057_p2), %s232_s12, 128, %s235_s14, %s223_s3  }
  0x3a   : > { %243 = sbr.rel (%p1007_p8) target bundleno = 735 (0x2df), region = 36  ;;  %s1068_s16 = sand.u32 (!%p1007_p8), 1, %s888_s19  }
  0x3b   : > { %s604_s25 = sshll.u32 (!%p1007_p8), %s1068_s16, 3  ;;  %s246_s6 = scalar_lea.sflag (!%p1007_p8), [#allocation3], %s1068_s16 }
  0x3c   : > { %s249_s10 = scalar_lea.vmem (!%p1007_p8), [#allocation2], %s604_s25  ;;  %p1224_p12 = scmp.ne.s32.totalorder (!%p1007_p8), %s1215_s28, 0 }
  0x3f   : > { %867 = dma.done.wait (%p1224_p12), %s246_s6, 128  }
  0x40   : > { %869 = vsyncadd (%p1224_p12), %s246_s6, 4294967168 }
  0x41   : > { %871 = dma.done.wait (%p987_p1), [#allocation6], 512  }
  0x42   : > { %873 = vsyncadd (%p987_p1), [#allocation6], 4294966784  ;;  %vm288_vm0 = vcmask 261120   ;;  %v285_v0 = vld [vmem:[%s249_s10] sm:$0xff]  ;;  %v910_v8 = vmov 0.0   ;;  %vm911_vm1 = vmmov 0  }
  0x43   : > { %v289_v1 = vsel %vm288_vm0, %v285_v0, 0.0  ;;  %v320_v7 = vld [vmem:[#allocation5 + $0x18] sm:$0xff]  ;;  %632 = vmatprep.subr.mxu0 %v910_v8  ;;  %v319_v9 = vld [vmem:[#allocation5 + $0x10] sm:$0xff]  ;;  %640 = vmatprep.mubr.msk.f32.mxu0 %vm911_vm1, %v910_v8  ;;  %v318_v10 = vld [vmem:[#allocation5 + $0x8] sm:$0xff]  ;;  %s606_s9 = sshll.u32 %s1068_s16, 5  ;;  %vm394_vm2 = vcmask 130048  }
  0x44   : > { %290 = vadd.xlane.f32.xlu0 %v289_v1  ;;  %633 = vmatpush3.msra.mxu0 %v320_v7  ;;  %v317_v11 = vld [vmem:[#allocation5] sm:$0xff]  ;;  %v608_v16 = vld [vmem:[%s1205_s1] ss:$0 sm:$0xff]  ;;  %s912_s11 = smov 48   ;;  %s913_s12 = smov 64  }
  0x45   : > { %634 = vmatprep.subr.mxu0 %v910_v8  ;;  %v609_v18 = vld [vmem:[%s1206_s2] ss:$0 sm:$0xff]  ;;  %s1090_s13 = scalar_lea.vmem [#allocation7], %s606_s9  ;;  %s914_s14 = smov 112  }
  0x46   : > { %635 = vmatpush3.msra.mxu0 %v319_v9  ;;  %s915_s27 = smov 96   ;;  %s916_s24 = smov 32  }
  0x47   : > { %636 = vmatprep.subr.mxu0 %v910_v8  ;;  %s917_s15 = smov 80   ;;  %s918_s8 = smov 16  }
  0x48   : > { %637 = vmatpush3.msra.mxu0 %v318_v10  ;;  %s1094_s25 = scalar_lea.vmem [#allocation8], %s606_s9  ;;  %s451_s6 = sshll.u32 %s1090_s13, 4  ;;  %s1107_s6 = int_to_ptr.vmem [resolvable:$true] %s451_s6 }
  0x49   : > { %638 = vmatprep.subr.mxu0 %v910_v8  ;;  %s625_s10 = sshll.u32 %s896_s21, 9  ;;  %s468_s3 = sshll.u32 %s1094_s25, 4  ;;  %s1118_s3 = int_to_ptr.vmem [resolvable:$true] %s468_s3 }
  0x4a   : > { %639 = vmatpush3.msra.mxu0 %v317_v11  ;;  %s1116_s30 = scalar_lea.hbm %s1208_s4, %s625_s10  ;;  %s432_s9 = scalar_lea.sflag [#allocation4], %s1068_s16 }
  0xcd   : > { %v291_v2 = vpop.xlane.xlu0 %290 }
  0xce   : > { %v293_v3 = vmul.f32 0.03125, %v291_v2 }
  0xd0   : > { %v294_v4 = vsub.f32 %v285_v0, %v293_v3 }
  0xd2   : > { %v295_v5 = vmul.f32 %v294_v4, %v294_v4 }
  0xd4   : > { %v296_v6 = vsel %vm288_vm0, %v295_v5, 0.0 }
  0xd5   : > { %297 = vadd.xlane.f32.xlu0 %v296_v6 }
 0x15e   : > { %v298_v12 = vpop.xlane.xlu0 %297 }
 0x15f   : > { %v299_v13 = vmul.f32 0.03125, %v298_v12 }
 0x161   : > { %v300_v14 = vadd.f32 1e-05, %v299_v13 }
 0x163   : > { %734 = vrsqrt.f32 %v300_v14 }
 0x170   : > { %v735_v15 = vpop.eup %734 }
 0x171   : > { %v302_v17 = vmul.f32 %v735_v15, %v294_v4 }
 0x173   : > { %v309_v19 = vmul.f32 %v608_v16, %v302_v17 }
 0x175   : > { %v316_v20 = vadd.f32 %v609_v18, %v309_v19 }
 0x177   : > { %641 = vmatmul.mubr.msk.f32.vlgmr.msra.gmra.mxu0 %vm288_vm0, %v316_v20 }
 0x237   : > { %v390_v21 = vpop.f32.mrf.mxu0 }
 0x238   : > { %406 = vrot.lane.b32.xlu0 %v390_v21, %s912_s11  ;;  %397 = vrot.lane.b32.xlu1 %v390_v21, %s913_s12  ;;  %395 = vst.msk [vmem:[%s1090_s13] sm:$0xff] %vm394_vm2, %v390_v21  ;;  %s790_s11 = scalar_lea.vmem %s1107_s6, 512  ;;  %s919_s12 = smov [#allocation7]  }
 0x239   : > { %v642_v22 = vpop.f32.mrf.mxu0  ;;  %p791_p1 = scmp.ne.s32.totalorder %s1107_s6, %s790_s11 }
 0x23b   : > { %p792_p8 = pnand %p791_p1, %p1040_p13 }
 0x23c   : > { %401 = vrot.lane.b32.xlu1 %v390_v21, %s914_s14  ;;  %s794_s14 = sshll.u32 %s919_s12, 4  ;;  %s795_s14 = int_to_ptr.vmem [resolvable:$false] %s794_s14 }
 0x23d   : > { %p793_p10 = pneg %p792_p8  ;;  %p797_p0 = scmp.lt.s32.totalorder %s1107_s6, %s795_s14 }
 0x240   : > { %411 = vrot.lane.b32.xlu1 %v390_v21, %s915_s27  ;;  %s796_s27 = scalar_lea.vmem %s795_s14, 1024 }
 0x241   : > { %p798_p2 = scmp.lt.s32.totalorder %s796_s27, %s790_s11 }
 0x243   : > { %p799_p3 = por %p798_p2, %p797_p0 }
 0x244   : > { %416 = vrot.lane.b32.xlu1 %v390_v21, %s916_s24 }
 0x245   : > { %p800_p5 = pnand %p799_p3, %p793_p10 }
 0x248   : > { %421 = vrot.lane.b32.xlu1 %v390_v21, %s917_s15 }
 0x24c   : > { %426 = vrot.lane.b32.xlu1 %v390_v21, %s918_s8 }
 0x2aa   : > { %v407_v23 = vpop.permute.xlu0 %406  ;;  %v398_v24 = vpop.permute.xlu1 %397 }
 0x2ab   : > { %612 = vst.msk [vmem:[%s1094_s25 + $0x8] sm:$0xff] %vm394_vm2, %v407_v23  ;;  %400 = vst.msk [vmem:[%s1094_s25] sm:$0xff] %vm394_vm2, %v398_v24 }
 0x2ae   : > { %v402_v25 = vpop.permute.xlu1 %401 }
 0x2af   : > { %611 = vst.msk [vmem:[%s1090_s13 + $0x8] sm:$0xff] %vm394_vm2, %v402_v25 }
 0x2b2   : > { %v412_v26 = vpop.permute.xlu1 %411 }
 0x2b3   : > { %613 = vst.msk [vmem:[%s1090_s13 + $0x10] sm:$0xff] %vm394_vm2, %v412_v26 }
 0x2b6   : > { %v417_v27 = vpop.permute.xlu1 %416 }
 0x2b7   : > { %614 = vst.msk [vmem:[%s1094_s25 + $0x10] sm:$0xff] %vm394_vm2, %v417_v27 }
 0x2ba   : > { %v422_v28 = vpop.permute.xlu1 %421 }
 0x2bb   : > { %615 = vst.msk [vmem:[%s1090_s13 + $0x18] sm:$0xff] %vm394_vm2, %v422_v28 }
 0x2bc   : > { %803 = shalt.err (!%p800_p5)
}
 0x2bd   : > { %s804_s13 = scalar_lea.hbm %s1116_s30, 512  ;;  %s808_s8 = scalar_lea.hbm %s1208_s4, 1024 }
 0x2be   : > { %p805_p7 = scmp.ne.s32.totalorder %s1116_s30, %s804_s13  ;;  %p809_p9 = scmp.lt.s32.totalorder %s1116_s30, %s1208_s4 }
 0x2bf   : > { %p810_p11 = scmp.lt.s32.totalorder %s808_s8, %s804_s13 }
 0x2c0   : > { %p806_p6 = pnand %p805_p7, %p1040_p13 }
 0x2c1   : > { %p811_p12 = por %p810_p11, %p809_p9 }
 0x2c2   : > { %p807_p4 = pneg %p806_p6 }
 0x2c4   : > { %p812_p1 = pnand %p811_p12, %p807_p4 }
 0x2c6   : > { %815 = shalt.err (!%p812_p1)
}
 0x2c7   : > { %s920_s11 = smov 128   ;;  %s921_s12 = smov 8   ;;  %v427_v29 = vpop.permute.xlu1 %426 }
 0x2c8   : > { %649 = dma.vmem_to_hbm [thread:$0]  (%p1040_p13), %s1107_s6, 512, %s1116_s30, %s432_s9, %s920_s11, %s920_s11, %s921_s12  }
 0x2c9   : > { %s1153_s13 = scalar_lea.hbm %s1209_s5, %s625_s10  ;;  %616 = vst.msk [vmem:[%s1094_s25 + $0x18] sm:$0xff] %vm394_vm2, %v427_v29  ;;  %s437_s24 = scalar_lea.sflag [#allocation9], %s1068_s16 }
 0x2ca   : > { %s816_s15 = scalar_lea.vmem %s1118_s3, 512  ;;  %s922_s8 = smov [#allocation8]  }
 0x2cb   : > { %p817_p8 = scmp.ne.s32.totalorder %s1118_s3, %s816_s15  ;;  %s820_s26 = sshll.u32 %s922_s8, 4  ;;  %s821_s26 = int_to_ptr.vmem [resolvable:$false] %s820_s26 }
 0x2cc   : > { %s822_s28 = scalar_lea.vmem %s821_s26, 1024  ;;  %p823_p2 = scmp.lt.s32.totalorder %s1118_s3, %s821_s26 }
 0x2cd   : > { %p818_p10 = pnand %p817_p8, %p1040_p13  ;;  %p824_p3 = scmp.lt.s32.totalorder %s822_s28, %s816_s15 }
 0x2cf   : > { %p819_p0 = pneg %p818_p10  ;;  %p825_p5 = por %p824_p3, %p823_p2 }
 0x2d1   : > { %p826_p7 = pnand %p825_p5, %p819_p0 }
 0x2d3   : > { %829 = shalt.err (!%p826_p7)
}
 0x2d4   : > { %s830_s21 = scalar_lea.hbm %s1153_s13, 512  ;;  %s834_s6 = scalar_lea.hbm %s1209_s5, 1024 }
 0x2d5   : > { %p831_p6 = scmp.ne.s32.totalorder %s1153_s13, %s830_s21  ;;  %p835_p11 = scmp.lt.s32.totalorder %s1153_s13, %s1209_s5 }
 0x2d6   : > { %p836_p12 = scmp.lt.s32.totalorder %s834_s6, %s830_s21 }
 0x2d7   : > { %p832_p4 = pnand %p831_p6, %p1040_p13 }
 0x2d8   : > { %p837_p1 = por %p836_p12, %p835_p11 }
 0x2d9   : > { %p833_p9 = pneg %p832_p4 }
 0x2db   : > { %p838_p8 = pnand %p837_p1, %p833_p9 }
 0x2dd   : > { %841 = shalt.err (!%p838_p8)
}
 0x2de   : > { %650 = dma.vmem_to_hbm [thread:$0]  (%p1040_p13), %s1118_s3, 512, %s1153_s13, %s437_s24, %s920_s11, %s920_s11, %s921_s12  }
 0x2df PF: > { %s483_s9 = sand.u32 1, %s884_s18   ;;  %p1225_p10 = scmp.ne.s32.totalorder %s1216_s29, 0 }
 0x2e0   : > { %p1226_p0 = scmp.ge.s32.totalorder %s904_s23, 2  ;;  %s484_s14 = scalar_lea.sflag [#allocation4], %s483_s9 }
 0x2e2   : > { %p662_p2 = pnand %p1226_p0, %p1225_p10 }
 0x2e4   : > { %p663_p3 = pneg %p662_p2 }
 0x2e6   : > { %875 = dma.done.wait (%p663_p3), %s484_s14, 512  }
 0x2e7   : > { %877 = vsyncadd (%p663_p3), %s484_s14, 4294966784  ;;  %s493_s27 = scalar_lea.sflag [#allocation9], %s483_s9 }
 0x2e8   : > { %879 = dma.done.wait (%p663_p3), %s493_s27, 512  }
 0x2e9   : > { %881 = vsyncadd (%p663_p3), %s493_s27, 4294966784  ;;  %s26_s23 = sadd.s32 1, %s904_s23   ;;  %s1227_s17 = sld [smem:[#allocation14_spill]] }
 0x2ea   : > { %p23_p5 = scmp.ge.s32.totalorder %s26_s23, 4   ;;  %s1228_s18 = smov %s888_s19 }
 0x2eb   : > { %s1229_s19 = smov %s892_s20  ;;  %s1230_s20 = smov %s1049_s7 }
 0x2ec   : > { %s1231_s21 = smov %s900_s22  ;;  %25 = sbr.rel (!%p23_p5) target bundleno = 11 (0xb), region = 108 }
 0x2ef   : > { %s1232_s22 = smov %s1227_s17 }
 0x2f1   :  { %498 = vsyncpa [#allocation3], 1 }
 0x2f2   :  { %500 = vsyncpa [#allocation3 + $0x1], 1 }
 0x2f3   :  { %501 = vsyncpa [#allocation6], 1 }
 0x2f4   :  { %502 = vsyncpa [#allocation4], 1 }
 0x2f5   :  { %504 = vsyncpa [#allocation4 + $0x1], 1 }
 0x2f6   :  { %505 = vsyncpa [#allocation9], 1 }
 0x2f7   :  { %507 = vsyncpa [#allocation9 + $0x1], 1 }

</bundles_post_ra>
